<compile_context>
chip_gen: v7x
topology: tpu7x:2x2x1
jax: 0.10.0
libtpu: 0.0.40
codegen_flags: <defaults>
</compile_context>

<pallas_src>
import jax
import jax.numpy as jnp
from jax.experimental import pallas as pl
from jax.experimental.pallas import tpu as pltpu


def _round_up(x, m):
    return ((x + m - 1) // m) * m


def _gcn_kernel(adj_ref, feat_ref, wt_ref, b_ref, out_ref):
    f_aug = feat_ref.shape[-1]          # F + 1; last column is the constant 1
    tile_n = adj_ref.shape[0]

    # Neighbor aggregation for this dst tile (fn.copy_src + fn.mean):
    # nsum[:, :F] = sum_j A[i, j] * feat[j];  nsum[:, F] = in-degree (ones column, MXU).
    nsum = jnp.dot(adj_ref[...], feat_ref[...], preferred_element_type=jnp.float32)
    deg = nsum[:, f_aug - 1:f_aug]                                     # (TN, 1)
    inv_deg = pl.reciprocal(jnp.maximum(deg, 1.0), approx=False)       # exact; not EUP-bound

    # Self rows sliced from the resident feature block (no second input stream / matmul).
    row0 = pl.multiple_of(pl.program_id(0) * tile_n, tile_n)
    h = feat_ref[pl.ds(row0, tile_n), :] + nsum * inv_deg              # h_self + h_neigh

    # rst = fc_self(h_self + h_neigh) = h @ W_self^T + b; the ones-column row of wt is 0.
    out_ref[...] = (jnp.dot(h, wt_ref[...], preferred_element_type=jnp.float32)
                    + b_ref[...]).astype(out_ref.dtype)


def gcn_forward(adj, features, w_self, b_self, *, tile_n=None):
    """adj: [N, N] float32 (A[dst, src] = 1), features: [N, F], w_self: [O, F], b_self: [O]."""
    n, f = features.shape
    o = w_self.shape[0]
    f_aug = f + 1

    # Dst-node tiling: single grid step for small graphs; 512-row tiles for larger ones.
    n8 = _round_up(n, 8)
    if tile_n is None:
        tile_n = n8 if n8 <= 512 else 512
    n_pad = _round_up(n8, tile_n)
    multi_tile = (n_pad // tile_n) > 1

    # Lane-dense output only when there is enough work for it to matter; at the stated
    # tiny size the masked stores are cheaper than extra padding glue.
    o_out = _round_up(o, 128) if multi_tile else o

    # Layout prep (kept minimal): features get a constant-1 column so A @ feat_aug
    # also yields the in-degree on the MXU.
    feat_aug = jnp.concatenate(
        [features, jnp.ones((n, 1), features.dtype)], axis=-1)             # (n, F+1)
    if n_pad != n:
        adj = jnp.zeros((n_pad, n_pad), adj.dtype).at[:n, :n].set(adj)
        feat_aug = jnp.zeros((n_pad, f_aug), feat_aug.dtype).at[:n, :].set(feat_aug)
    if o_out != o:
        wt_aug = jnp.zeros((f_aug, o_out), w_self.dtype).at[:f, :o].set(w_self.T)
        b_p = jnp.zeros((1, o_out), b_self.dtype).at[0, :o].set(b_self)
    else:
        wt_aug = jnp.concatenate(
            [w_self.T, jnp.zeros((1, o), w_self.dtype)], axis=0)            # (F+1, O)
        b_p = b_self.reshape(1, o)

    compiler_params = pltpu.CompilerParams(
        dimension_semantics=("parallel",),
        vmem_limit_bytes=(
            min(4 * (2 * tile_n * n_pad + n_pad * f_aug + f_aug * o_out
                     + o_out + 2 * tile_n * o_out) + (2 << 20), 128 << 20)
            if multi_tile else None),
    )

    out = pl.pallas_call(
        _gcn_kernel,
        out_shape=jax.ShapeDtypeStruct((n_pad, o_out), features.dtype),
        grid_spec=pltpu.PrefetchScalarGridSpec(
            num_scalar_prefetch=0,
            grid=(n_pad // tile_n,),
            in_specs=[
                pl.BlockSpec((tile_n, n_pad), lambda i: (i, 0)),   # adjacency rows (per dst tile)
                pl.BlockSpec((n_pad, f_aug), lambda i: (0, 0)),    # resident [features | 1]
                pl.BlockSpec((f_aug, o_out), lambda i: (0, 0)),    # resident fc_self weight^T (+0 row)
                pl.BlockSpec((1, o_out), lambda i: (0, 0)),        # resident fc_self bias
            ],
            out_specs=pl.BlockSpec((tile_n, o_out), lambda i: (i, 0)),
        ),
        compiler_params=compiler_params,
    )(adj, feat_aug, wt_aug, b_p)

    if n_pad != n or o_out != o:
        out = out[:n, :o]
    return out


def gcn_reference(adj, features, w_self, b_self):
    deg = jnp.sum(adj, axis=-1, keepdims=True)
    h_neigh = (adj @ features) / jnp.maximum(deg, 1.0)
    h = features + h_neigh
    return h @ w_self.T + b_self[None, :]


if __name__ == "__main__":
    # Small deterministic setup consistent with the module:
    # PERSON_NUM=2, JOINT_NUM=16 -> N = 32 nodes, in_feats=32, out_feats=32.
    PERSON_NUM, JOINT_NUM = 2, 16
    N = PERSON_NUM * JOINT_NUM
    IN_FEATS, OUT_FEATS = 32, 32

    key = jax.random.PRNGKey(0)
    k_feat, k_adj, k_w, k_b = jax.random.split(key, 4)

    features = jax.random.normal(k_feat, (N, IN_FEATS), dtype=jnp.float32)

    # Deterministic random graph as a dense adjacency (A[dst, src] = 1.0).
    adj = jax.random.bernoulli(k_adj, p=0.25, shape=(N, N)).astype(jnp.float32)

    # fc_self: Linear(in_feats, out_feats), xavier-uniform-ish weight, uniform bias.
    gain = jnp.sqrt(2.0)  # calculate_gain('relu')
    limit_w = gain * jnp.sqrt(6.0 / (IN_FEATS + OUT_FEATS))
    w_self = jax.random.uniform(k_w, (OUT_FEATS, IN_FEATS), dtype=jnp.float32,
                                minval=-limit_w, maxval=limit_w)
    limit_b = 1.0 / jnp.sqrt(IN_FEATS)
    b_self = jax.random.uniform(k_b, (OUT_FEATS,), dtype=jnp.float32,
                                minval=-limit_b, maxval=limit_b)

    out = gcn_forward(adj, features, w_self, b_self)
    out = jax.block_until_ready(out)

    ref = gcn_reference(adj, features, w_self, b_self)
    assert out.shape == (N, OUT_FEATS)
    # Exact reciprocal now; the only remaining difference is fp32 MXU accumulation order.
    assert jnp.allclose(out, ref, atol=1e-3, rtol=1e-3)

    print("KERNEL_OK")
</pallas_src>

<mosaic_0001>
module attributes {stable_mosaic.version = 11 : i64} {
  func.func @_gcn_kernel(%arg0: i32, %arg1: memref<32x32xf32, #tpu.memory_space<vmem>>, %arg2: memref<32x33xf32, #tpu.memory_space<vmem>>, %arg3: memref<33x32xf32, #tpu.memory_space<vmem>>, %arg4: memref<1x32xf32, #tpu.memory_space<vmem>>, %arg5: memref<32x32xf32, #tpu.memory_space<vmem>>) attributes {dimension_semantics = [#tpu.dimension_semantics<parallel>], iteration_bounds = array<i64: 1>, scalar_prefetch = 0 : i64, scratch_operands = 0 : i64, tpu.core_type = #tpu.core_type<tc>, window_params = [{transform_indices = @transform_0, window_bounds = array<i64: 32, 32>}, {pipeline_mode = #tpu.pipeline_mode<synchronous>, transform_indices = @transform_1, window_bounds = array<i64: 32, 33>}, {pipeline_mode = #tpu.pipeline_mode<synchronous>, transform_indices = @transform_2, window_bounds = array<i64: 33, 32>}, {pipeline_mode = #tpu.pipeline_mode<synchronous>, transform_indices = @transform_3, window_bounds = array<i64: 1, 32>}, {transform_indices = @transform_4, window_bounds = array<i64: 32, 32>}]} {
    %c0 = arith.constant 0 : index
    %c0_0 = arith.constant 0 : index
    %0 = vector.load %arg1[%c0, %c0_0] : memref<32x32xf32, #tpu.memory_space<vmem>>, vector<32x32xf32>
    %c0_1 = arith.constant 0 : index
    %c0_2 = arith.constant 0 : index
    %1 = vector.load %arg2[%c0_1, %c0_2] : memref<32x33xf32, #tpu.memory_space<vmem>>, vector<32x33xf32>
    %cst = arith.constant dense<0.000000e+00> : vector<32x33xf32>
    %2 = tpu.matmul %0, %1, %cst {dimension_numbers = #tpu.dot_dimension_numbers<[1], [0], [0], [1], [0, 0, 1, 1], [], []>} : vector<32x32xf32>, vector<32x33xf32>, vector<32x33xf32> -> vector<32x33xf32>
    %3 = vector.extract_strided_slice %2 {offsets = [0, 32], sizes = [32, 1], strides = [1, 1]} : vector<32x33xf32> to vector<32x1xf32>
    %cst_3 = arith.constant 1.000000e+00 : f32
    %4 = vector.broadcast %cst_3 : f32 to vector<32x1xf32>
    %5 = arith.maximumf %3, %4 : vector<32x1xf32>
    %6 = tpu.reciprocal %5 : vector<32x1xf32> -> vector<32x1xf32>
    %c32_i32 = arith.constant 32 : i32
    %7 = arith.muli %arg0, %c32_i32 : i32
    %8 = tpu.assume_multiple %7, 32 : i32
    %9 = arith.index_cast %8 : i32 to index
    %c0_4 = arith.constant 0 : index
    %10 = vector.load %arg2[%9, %c0_4] : memref<32x33xf32, #tpu.memory_space<vmem>>, vector<32x33xf32>
    %11 = vector.broadcast %6 : vector<32x1xf32> to vector<32x33xf32>
    %12 = arith.mulf %2, %11 : vector<32x33xf32>
    %13 = arith.addf %10, %12 : vector<32x33xf32>
    %c0_5 = arith.constant 0 : index
    %c0_6 = arith.constant 0 : index
    %14 = vector.load %arg3[%c0_5, %c0_6] : memref<33x32xf32, #tpu.memory_space<vmem>>, vector<33x32xf32>
    %cst_7 = arith.constant dense<0.000000e+00> : vector<32x32xf32>
    %15 = tpu.matmul %13, %14, %cst_7 {dimension_numbers = #tpu.dot_dimension_numbers<[1], [0], [0], [1], [0, 0, 1, 1], [], []>} : vector<32x33xf32>, vector<33x32xf32>, vector<32x32xf32> -> vector<32x32xf32>
    %c0_8 = arith.constant 0 : index
    %c0_9 = arith.constant 0 : index
    %16 = vector.load %arg4[%c0_8, %c0_9] : memref<1x32xf32, #tpu.memory_space<vmem>>, vector<1x32xf32>
    %17 = vector.broadcast %16 : vector<1x32xf32> to vector<32x32xf32>
    %18 = arith.addf %15, %17 : vector<32x32xf32>
    %c0_10 = arith.constant 0 : index
    %c0_11 = arith.constant 0 : index
    %19 = vector.load %arg5[%c0_10, %c0_11] : memref<32x32xf32, #tpu.memory_space<vmem>>, vector<32x32xf32>
    tpu.vector_store %arg5[%c0_10, %c0_11], %18 {strides = array<i32>} : memref<32x32xf32, #tpu.memory_space<vmem>>, vector<32x32xf32>,
    return
  }
  func.func @transform_0(%arg0: i32) -> (i32, i32) {
    %c0_i32 = arith.constant 0 : i32
    %c0_i32_0 = arith.constant 0 : i32
    return %arg0, %c0_i32 : i32, i32
  }
  func.func @transform_1(%arg0: i32) -> (i32, i32) {
    %c0_i32 = arith.constant 0 : i32
    %c0_i32_0 = arith.constant 0 : i32
    %c0_i32_1 = arith.constant 0 : i32
    return %c0_i32, %c0_i32_0 : i32, i32
  }
  func.func @transform_2(%arg0: i32) -> (i32, i32) {
    %c0_i32 = arith.constant 0 : i32
    %c0_i32_0 = arith.constant 0 : i32
    %c0_i32_1 = arith.constant 0 : i32
    return %c0_i32, %c0_i32_0 : i32, i32
  }
  func.func @transform_3(%arg0: i32) -> (i32, i32) {
    %c0_i32 = arith.constant 0 : i32
    %c0_i32_0 = arith.constant 0 : i32
    %c0_i32_1 = arith.constant 0 : i32
    return %c0_i32, %c0_i32_0 : i32, i32
  }
  func.func @transform_4(%arg0: i32) -> (i32, i32) {
    %c0_i32 = arith.constant 0 : i32
    %c0_i32_0 = arith.constant 0 : i32
    return %arg0, %c0_i32 : i32, i32
  }
}

</mosaic_0001>

<bundles_post_ra>
// kernel: tpu_custom_call.1
= control target key start
LH: loop header
LB: loop body
LE: loop exit
PB: predicated region body
PF: predicated region fallthrough
CT: control target
= control target key end

     0   :  { %vm26_vm0 = vcmask 261120   ;;  %s514_s0 = inlined_call_operand.vmem [shape: f32[32,32], index: 0, kind: input, shape index: {}]   ;;  %s515_s1 = inlined_call_operand.vmem [shape: f32[32,33], index: 1, kind: input, shape index: {}]   ;;  %s516_s2 = inlined_call_operand.vmem [shape: f32[33,32], index: 2, kind: input, shape index: {}]   ;;  %s517_s3 = inlined_call_operand.vmem [shape: f32[1,32], index: 3, kind: input, shape index: {}]   ;;  %s518_s4 = inlined_call_operand.hbm [shape: f32[32,32], index: 4, kind: output, shape index: {}]  }
   0x1   :  { %v22_v0 = vld [vmem:[%s515_s1] sm:$0xff]  ;;  %v446_v1 = vld [vmem:[%s515_s1 + $0x8] sm:$0xff]  ;;  %v451_v2 = vld [vmem:[%s515_s1 + $0x10] sm:$0xff] }
   0x2   :  { %v357_v3 = vpack.c.bf16 %v446_v1, %v22_v0  ;;  %v457_v4 = vld [vmem:[%s515_s1 + $0x18] sm:$0xff]  ;;  %v18_v5 = vld [vmem:[%s514_s0] sm:$0xff] }
   0x3   :  { %v361_v6 = vpack.c.bf16 %v457_v4, %v451_v2  ;;  %335 = vmatprep.mubr.msk.f32.mxu0 %vm26_vm0, %v18_v5 }
   0x4   :  { %9 = vsyncpa [#allocation3], 0  ;;  %358 = vmatprep.subr.bf16.mxu0 %v357_v3  ;;  %v19_v7 = vld [vmem:[%s514_s0 + $0x8] sm:$0xff]  ;;  %v20_v8 = vld [vmem:[%s514_s0 + $0x10] sm:$0xff]  ;;  %v411_v10 = vmov 32   ;;  %vm191_vm1 = vcmask 1040384  }
   0x5   :  { %360 = vmatpush3.bf16.msra.mxu0 %v357_v3  ;;  %v21_v9 = vld [vmem:[%s514_s0 + $0x18] sm:$0xff]  ;;  %377 = vset.pattern.permute.xlu0 %v411_v10  ;;  %v166_v11 = vld [vmem:[%s516_s2] sm:$0xff]  ;;  %v167_v12 = vld [vmem:[%s516_s2 + $0x8] sm:$0xff]  ;;  %vm178_vm2 = vcmask 269312   ;;  %s412_s14 = smov [#allocation2]  }
   0x6   :  { %362 = vmatprep.subr.bf16.mxu0 %v361_v6  ;;  %378 = vset.pattern.permute.xlu1 %v411_v10  ;;  %v365_v13 = vpack.c.bf16 %v167_v12, %v166_v11  ;;  %v168_v23 = vld [vmem:[%s516_s2 + $0x10] sm:$0xff]  ;;  %v169_v24 = vld [vmem:[%s516_s2 + $0x18] sm:$0xff]  ;;  %v170_v28 = vld [vmem:[%s516_s2 + $0x20] sm:$0x1]  ;;  %s289_s15 = sshll.u32 %s412_s14, 4  ;;  %s290_s15 = int_to_ptr.vmem [resolvable:$true] %s289_s15 }
   0x7   :  { %v369_v25 = vpack.c.bf16 %v169_v24, %v168_v23  ;;  %v304_v42 = vld [vmem:[%s517_s3] ss:$0 sm:$0xff]  ;;  %s387_s3 = scalar_lea.vmem %s290_s15, 512  ;;  %p392_p1 = scmp.lt.s32.totalorder %s290_s15, %s290_s15 }
   0x8   :  { %366 = vmatprep.subr.bf16.mxu1 %v365_v13  ;;  %p388_p0 = scmp.ne.s32.totalorder %s290_s15, %s387_s3  ;;  %p393_p2 = scmp.lt.s32.totalorder %s387_s3, %s387_s3 }
   0x9   :  { %364 = vmatpush3.bf16.msra.mxu0 %v361_v6  ;;  %368 = vmatpush3.bf16.msra.mxu1 %v365_v13 }
   0xa   :  { %370 = vmatprep.subr.bf16.mxu1 %v369_v25  ;;  %p394_p3 = por %p393_p2, %p392_p1 }
   0xc   :  { %336 = vmatmul.mubr.msk.f32.vlgmr.msra.gmra.mrb[0].mxu0 %vm26_vm0, %v19_v7  ;;  %p395_p4 = pnand %p394_p3, %p388_p0 }
   0xd   :  { %338 = vmatprep.mubr.msk.f32.mxu0 %vm26_vm0, %v20_v8  ;;  %372 = vmatpush3.bf16.msra.mxu1 %v369_v25 }
   0xe   :  { %349 = vmatprep.subr.msk.mxu1 %vm191_vm1, %v170_v28 }
  0x10   :  { %339 = vmatmul.mubr.msk.f32.gmra.mrb[2].mxu0 %vm26_vm0, %v21_v9 }
  0x11   :  { %350 = vmatpush3.msk.msra.mxu1 %vm191_vm1, %v170_v28 }
  0xdf   :  { %v337_v14 = vpop.f32.mrb[0].mxu0 }
  0xe0   :  { %v105_v15 = vpop.f32.mrb[1].mxu0  ;;  %v125_v17 = vmax.f32 %v337_v14, 1.0 }
  0xe1   :  { %v124_v16 = vmax.f32 %v105_v15, 1.0 }
  0xe3   :  { %379 = vrcp.f32 %v124_v16  ;;  %v340_v18 = vpop.f32.mrb[2].mxu0 }
  0xe4   :  { %v115_v19 = vpop.f32.mrb[3].mxu0  ;;  %381 = vrcp.f32 %v125_v17  ;;  %v127_v21 = vmax.f32 %v340_v18, 1.0 }
  0xe5   :  { %v126_v20 = vmax.f32 %v115_v19, 1.0 }
  0xe7   :  { %383 = vrcp.f32 %v126_v20 }
  0xe8   :  { %385 = vrcp.f32 %v127_v21 }
  0xed   :  { %v380_v22 = vpop.eup %379 }
  0xee   :  { %140 = vperm.xlu0 %377, %v380_v22   ;;  %v382_v26 = vpop.eup %381 }
  0xf1   :  { %v384_v27 = vpop.eup %383 }
  0xf2   :  { %145 = vperm.xlu0 %377, %v382_v26   ;;  %150 = vperm.xlu1 %378, %v384_v27   ;;  %v386_v29 = vpop.eup %385 }
  0xf6   :  { %155 = vperm.xlu1 %378, %v386_v29  }
 0x16d   :  { %v141_v30 = vpop.permute.xlu0 %140 }
 0x16e   :  { %v158_v31 = vmul.f32 %v141_v30, %v105_v15 }
 0x170   :  { %v162_v32 = vadd.f32 %v158_v31, %v22_v0 }
 0x171   :  { %v146_v33 = vpop.permute.xlu0 %145  ;;  %v151_v34 = vpop.permute.xlu1 %150 }
 0x172   :  { %v159_v35 = vmul.f32 %v337_v14, %v146_v33  ;;  %v160_v36 = vmul.f32 %v151_v34, %v115_v19  ;;  %351 = vmatprep.mubr.msk.f32.mxu1 %vm178_vm2, %v162_v32 }
 0x174   :  { %v163_v37 = vadd.f32 %v159_v35, %v446_v1  ;;  %v164_v38 = vadd.f32 %v160_v36, %v451_v2 }
 0x175   :  { %v156_v39 = vpop.permute.xlu1 %155 }
 0x176   :  { %v161_v40 = vmul.f32 %v340_v18, %v156_v39  ;;  %352 = vmatmul.mubr.msk.f32.vlgmr.msra.gmra.mrb[0].mxu1 %vm178_vm2, %v163_v37 }
 0x177   :  { %354 = vmatprep.mubr.msk.f32.mxu1 %vm178_vm2, %v164_v38 }
 0x178   :  { %v165_v41 = vadd.f32 %v161_v40, %v457_v4 }
 0x17a   :  { %355 = vmatmul.mubr.msk.f32.gmra.mrb[2].mxu1 %vm178_vm2, %v165_v41 }
 0x249   :  { %v353_v43 = vpop.f32.mrb[0].mxu1 }
 0x24a   :  { %v267_v44 = vadd.f32 %v353_v43, %v304_v42  ;;  %v261_v45 = vpop.f32.mrb[1].mxu1 }
 0x24b   :  { %v262_v46 = vadd.f32 %v304_v42, %v261_v45 }
 0x24c   :  { %281 = vst.msk [vmem:[#allocation2 + $0x8] sm:$0xff] %vm26_vm0, %v267_v44 }
 0x24d   :  { %280 = vst.msk [vmem:[#allocation2] sm:$0xff] %vm26_vm0, %v262_v46  ;;  %v356_v47 = vpop.f32.mrb[2].mxu1 }
 0x24e   :  { %v277_v48 = vadd.f32 %v356_v47, %v304_v42  ;;  %v271_v49 = vpop.f32.mrb[3].mxu1 }
 0x24f   :  { %v272_v50 = vadd.f32 %v304_v42, %v271_v49 }
 0x250   :  { %283 = vst.msk [vmem:[#allocation2 + $0x18] sm:$0xff] %vm26_vm0, %v277_v48 }
 0x251   :  { %282 = vst.msk [vmem:[#allocation2 + $0x10] sm:$0xff] %vm26_vm0, %v272_v50 }
 0x252   :  { %398 = shalt.err (!%p395_p4)
}
 0x253   :  { %s399_s18 = scalar_lea.hbm %s518_s4, 512 }
 0x254   :  { %p400_p5 = scmp.ne.s32.totalorder %s518_s4, %s399_s18  ;;  %p403_p6 = scmp.lt.u32.totalorder %s399_s18, %s518_s4 }
 0x256   :  { %p405_p7 = pnand %p403_p6, %p400_p5 }
 0x258   :  { %408 = shalt.err (!%p405_p7)
}
 0x259   :  { %s413_s23 = smov 128   ;;  %s414_s24 = smov 8  }
 0x25a   :  { %295 = dma.vmem_to_hbm [thread:$0]  %s290_s15, 512, %s518_s4, [#allocation3], %s413_s23, %s413_s23, %s414_s24  }
 0x25b   :  { %409 = dma.done.wait [#allocation3], 512  }
 0x25c   :  { %410 = vsyncadd [#allocation3], 4294966784 }
 0x25d   :  { %299 = vsyncpa [#allocation3], 1 }

</bundles_post_ra>
